<compile_context>
chip_gen: v5e
topology: v5e:2x2
jax: 0.10.0
libtpu: 0.0.40
codegen_flags: <defaults>
</compile_context>

<pallas_src>
import functools

import numpy as np
import jax
import jax.numpy as jnp
from jax.experimental import pallas as pl
from jax.experimental.pallas import tpu as pltpu

_LANE = 128
_MIN_TILE_N = 128
_MAX_TILE_N = 32768            # rows (lanes) per grid step, upper cap
_VMEM_TILE_BUDGET = 16 << 20   # double-buffered in+out+keep tile footprint
_SPLIT_THRESHOLD = 8192        # force >=2 grid steps above this many rows (v7x)


def _round_up(x, m):
    return ((x + m - 1) // m) * m


def _choose_tiling(n, l):
    """Pick (n_pad, tile_n, grid_n) for the lane (row) axis."""
    # Double-buffered bytes per lane: f32 in (4*l) + f32 out (4*l) + i32 keep (4).
    bytes_per_lane = 2 * (8 * l + 4)
    tile_cap = (_VMEM_TILE_BUDGET // bytes_per_lane) // _LANE * _LANE
    tile_cap = max(_MIN_TILE_N, min(_MAX_TILE_N, tile_cap))

    n_pad = _round_up(max(n, _MIN_TILE_N), _LANE)
    if n_pad <= tile_cap:
        if n_pad >= _SPLIT_THRESHOLD:
            # Two grid steps so v7x's 2 TensorCores both get work; on v5e/v6e
            # the extra step costs ~0.35us, negligible at this size.
            tile = _round_up(-(-n_pad // 2), _LANE)
            return 2 * tile, tile, 2
        return n_pad, n_pad, 1

    num_steps = -(-n_pad // tile_cap)          # >= 2 here
    tile = _round_up(-(-n_pad // num_steps), _LANE)
    return tile * num_steps, tile, num_steps


def _sanitize_kernel(scal_ref, lm_ref, clamped_ref, keep_ref):
    """Per-row sanity check + clamp on a transposed tile.

    scal_ref    : (4,) f32 SMEM  [min_val, max_val, thr_x, thr_y]
    lm_ref      : (L, TILE_N) f32   landmarks transposed (rows on lane axis)
    clamped_ref : (L, TILE_N) f32   clamp(landmarks, min_val, max_val)
    keep_ref    : (1, TILE_N) int32 1 if row passes the 80% validity test
    """
    min_v = scal_ref[0]
    max_v = scal_ref[1]
    thr_x = scal_ref[2]
    thr_y = scal_ref[3]

    lm = lm_ref[...]

    # Validity window matches the PyTorch module (hardcoded -0.1 .. 1.1).
    valid = ((lm >= -0.1) & (lm <= 1.1)).astype(jnp.float32)

    # Even sublanes are x coordinates, odd sublanes are y coordinates.
    sub = jax.lax.broadcasted_iota(jnp.int32, lm.shape, 0)
    is_x = (sub & 1) == 0

    # Fused reduction: one masked sum + one total sum; y = total - x.
    x_count = jnp.sum(jnp.where(is_x, valid, 0.0), axis=0, keepdims=True)
    total = jnp.sum(valid, axis=0, keepdims=True)
    y_count = total - x_count

    keep = (x_count >= thr_x) & (y_count >= thr_y)
    keep_ref[...] = keep.astype(jnp.int32)

    clamped_ref[...] = jnp.clip(lm, min_v, max_v)


@functools.lru_cache(maxsize=None)
def _build_sanitize_call(l, n_pad, tile_n, grid_n):
    call = pl.pallas_call(
        _sanitize_kernel,
        out_shape=(
            jax.ShapeDtypeStruct((l, n_pad), jnp.float32),
            jax.ShapeDtypeStruct((1, n_pad), jnp.int32),
        ),
        grid_spec=pltpu.PrefetchScalarGridSpec(
            num_scalar_prefetch=1,
            grid=(grid_n,),
            in_specs=[pl.BlockSpec((l, tile_n), lambda i, scal: (0, i))],
            out_specs=(
                pl.BlockSpec((l, tile_n), lambda i, scal: (0, i)),
                pl.BlockSpec((1, tile_n), lambda i, scal: (0, i)),
            ),
        ),
        compiler_params=pltpu.CompilerParams(
            dimension_semantics=("parallel",),
            vmem_limit_bytes=32 << 20,
        ),
    )
    return jax.jit(call)


def _sanitize_device(lm_np, min_val, max_val):
    """Run the Pallas kernel.

    lm_np: (N, L) host array with interleaved x/y coordinates along L.
    Returns (clamped_t (L, N_pad) f32 device, keep (1, N_pad) int32 device, N).
    """
    lm_np = np.asarray(lm_np, dtype=np.float32)
    n, l = lm_np.shape
    n_pad, tile_n, grid_n = _choose_tiling(n, l)

    # Host-side transpose + zero-pad (single memcpy; replaces two full device
    # HBM passes from the old jnp.transpose + jnp.pad).
    lm_t = np.zeros((l, n_pad), dtype=np.float32)
    lm_t[:, :n] = lm_np.T

    # Integer-count thresholds: count/num >= 4/5  <=>  count >= ceil(4*num/5).
    num_x = (l + 1) // 2
    num_y = l // 2
    thr_x = -((-4 * num_x) // 5)
    # torch: mean over an empty y slice is NaN -> keep is False; emulate by
    # making the y threshold unreachable when there are no y coordinates.
    thr_y = 1 if num_y == 0 else -((-4 * num_y) // 5)

    scalars = jnp.asarray(
        np.array([min_val, max_val, thr_x, thr_y], dtype=np.float32))

    call = _build_sanitize_call(l, n_pad, tile_n, grid_n)
    clamped_t, keep = call(scalars, jnp.asarray(lm_t))
    return clamped_t, keep, n


def sanitize_landmarks(lm_np, min_val=0.0, max_val=1.0):
    """Returns (clamped (N, L) np.float32, keep (N,) np.bool_)."""
    clamped_t, keep, n = _sanitize_device(lm_np, min_val, max_val)
    clamped_t_np, keep_np = jax.device_get((clamped_t, keep))
    # Host numpy transpose is a view; no extra device HBM pass.
    clamped = clamped_t_np.T[:n]
    return clamped, keep_np[0, :n].astype(bool)


def strict_sanitize_landmarks(img, target=None,
                              min_val=0.0, max_val=1.0,
                              remove_invalid=True):
    """Forward pass mirroring StrictSanitizeLandmarks.forward."""
    if target is None or 'landmarks' not in target:
        return img, target

    landmarks = np.asarray(target['landmarks'])
    if landmarks.size == 0:
        return img, target

    # Kernel: keep mask + clamped landmarks computed on TPU in one launch.
    clamped_np, keep_np = sanitize_landmarks(landmarks, min_val, max_val)

    target = dict(target)  # shallow copy (transform-style update)

    if remove_invalid:
        if keep_np.any():
            # TODO(synk): dynamic-size boolean filtering (data-dependent output
            # shape) has no static-shape Pallas equivalent; done host-side to
            # match torch boolean-indexing semantics.
            for key in ['boxes', 'labels', 'area', 'iscrowd']:
                if key in target and np.asarray(target[key]).size > 0:
                    target[key] = np.asarray(target[key])[keep_np]
            # filter + clamp (elementwise, equivalent to the torch order)
            target['landmarks'] = clamped_np[keep_np]
        else:
            num_landmarks = landmarks.shape[1]
            target['landmarks'] = np.zeros((0, num_landmarks), np.float32)
            target['boxes'] = np.zeros((0, 4), np.float32)
            target['labels'] = np.zeros((0,), np.int64)
            target['area'] = np.zeros((0,), np.float32)
            target['iscrowd'] = np.zeros((0,), np.int64)
    else:
        if np.asarray(target['landmarks']).size > 0:
            target['landmarks'] = np.ascontiguousarray(clamped_np)

    return img, target


if __name__ == "__main__":
    key = jax.random.PRNGKey(0)
    k_img, k_lm, k_box, k_lab, k_area = jax.random.split(key, 5)

    # Small deterministic inputs: 8 objects, 5 keypoints (L = 10 coords).
    N, L = 8, 10
    img = jax.random.uniform(k_img, (3, 16, 16), dtype=jnp.float32)

    # Landmarks in [0,1], with rows pushed out of range so keep / reject and
    # the exact-80% boundary are exercised deterministically.
    lm = jax.random.uniform(k_lm, (N, L), minval=0.0, maxval=1.0,
                            dtype=jnp.float32)
    lm = lm.at[2].add(2.0)      # row 2: everything out of range -> rejected
    lm = lm.at[5].add(-3.0)     # row 5: everything out of range -> rejected
    lm = lm.at[3, 0].set(5.0)   # row 3: exactly 4/5 x valid (80% boundary) -> kept
    lm = lm.at[6, 0].set(5.0)   # row 6: 3/5 x valid -> rejected
    lm = lm.at[6, 2].set(-5.0)
    lm_np = np.asarray(lm)

    # Run the kernel once and block on its device outputs.
    clamped_t_dev, keep_dev, n_rows = _sanitize_device(lm_np, 0.0, 1.0)
    jax.block_until_ready((clamped_t_dev, keep_dev))

    clamped_t_np, keep_full = jax.device_get((clamped_t_dev, keep_dev))
    clamped_np = clamped_t_np.T[:n_rows]
    keep_np = keep_full[0, :n_rows].astype(bool)

    # Reference check of the keep mask / clamp against plain NumPy (torch semantics).
    x = lm_np[:, 0::2]
    y = lm_np[:, 1::2]
    x_valid = ((x >= -0.1) & (x <= 1.1)).astype(np.float32).mean(axis=1)
    y_valid = ((y >= -0.1) & (y <= 1.1)).astype(np.float32).mean(axis=1)
    keep_ref = (x_valid >= 0.8) & (y_valid >= 0.8)

    assert np.array_equal(keep_np, keep_ref)
    assert keep_np[3] and not keep_np[2] and not keep_np[5] and not keep_np[6]
    assert np.allclose(clamped_np, np.clip(lm_np, 0.0, 1.0))

    target = {
        'landmarks': lm_np,
        'boxes': np.asarray(jax.random.uniform(k_box, (N, 4), dtype=jnp.float32)),
        'labels': np.asarray(
            jax.random.randint(k_lab, (N,), 0, 10)).astype(np.int64),
        'area': np.asarray(jax.random.uniform(k_area, (N,), dtype=jnp.float32)),
        'iscrowd': np.zeros((N,), np.int64),
    }

    # Full transform: remove_invalid=True path.
    out_img, out_target = strict_sanitize_landmarks(img, dict(target))
    jax.block_until_ready(out_img)
    n_keep = int(keep_ref.sum())
    assert out_target['landmarks'].shape == (n_keep, L)
    assert out_target['boxes'].shape[0] == n_keep
    assert out_target['labels'].shape[0] == n_keep
    if out_target['landmarks'].size > 0:
        assert float(out_target['landmarks'].min()) >= 0.0
        assert float(out_target['landmarks'].max()) <= 1.0

    # remove_invalid=False path (clamp only; reuses the cached compiled call).
    _, out_target2 = strict_sanitize_landmarks(img, dict(target),
                                               remove_invalid=False)
    assert out_target2['landmarks'].shape == (N, L)
    assert float(out_target2['landmarks'].min()) >= 0.0
    assert float(out_target2['landmarks'].max()) <= 1.0

    # Pass-through paths (no kernel launch).
    _, none_target = strict_sanitize_landmarks(img, None)
    assert none_target is None

    print("KERNEL_OK")
</pallas_src>

<mosaic_0001>
module attributes {stable_mosaic.version = 11 : i64} {
  func.func @_sanitize_kernel(%arg0: i32, %arg1: memref<4xf32, #tpu.memory_space<smem>>, %arg2: memref<10x128xf32, #tpu.memory_space<vmem>>, %arg3: memref<10x128xf32, #tpu.memory_space<vmem>>, %arg4: memref<1x128xi32, #tpu.memory_space<vmem>>) attributes {dimension_semantics = [#tpu.dimension_semantics<parallel>], iteration_bounds = array<i64: 1>, scalar_prefetch = 1 : i64, scratch_operands = 0 : i64, tpu.core_type = #tpu.core_type<tc>, window_params = [{transform_indices = @transform_0, window_bounds = array<i64: 10, 128>}, {transform_indices = @transform_1, window_bounds = array<i64: 10, 128>}, {transform_indices = @transform_2, window_bounds = array<i64: 1, 128>}]} {
    %c0 = arith.constant 0 : index
    %0 = memref.load %arg1[%c0] : memref<4xf32, #tpu.memory_space<smem>>
    %c1 = arith.constant 1 : index
    %1 = memref.load %arg1[%c1] : memref<4xf32, #tpu.memory_space<smem>>
    %c2 = arith.constant 2 : index
    %2 = memref.load %arg1[%c2] : memref<4xf32, #tpu.memory_space<smem>>
    %c3 = arith.constant 3 : index
    %3 = memref.load %arg1[%c3] : memref<4xf32, #tpu.memory_space<smem>>
    %c0_0 = arith.constant 0 : index
    %c0_1 = arith.constant 0 : index
    %4 = vector.load %arg2[%c0_0, %c0_1] : memref<10x128xf32, #tpu.memory_space<vmem>>, vector<10x128xf32>
    %cst = arith.constant -1.000000e-01 : f32
    %5 = vector.broadcast %cst : f32 to vector<10x128xf32>
    %6 = arith.cmpf oge, %4, %5 : vector<10x128xf32>
    %cst_2 = arith.constant 1.100000e+00 : f32
    %7 = vector.broadcast %cst_2 : f32 to vector<10x128xf32>
    %8 = arith.cmpf ole, %4, %7 : vector<10x128xf32>
    %9 = arith.andi %6, %8 : vector<10x128xi1>
    %10 = arith.extui %9 : vector<10x128xi1> to vector<10x128xi32>
    %11 = arith.sitofp %10 : vector<10x128xi32> to vector<10x128xf32>
    %12 = tpu.iota {dimensions = array<i32: 0>} : vector<10x128xi32>
    %c1_i32 = arith.constant 1 : i32
    %13 = vector.broadcast %c1_i32 : i32 to vector<10x128xi32>
    %14 = arith.andi %12, %13 : vector<10x128xi32>
    %c0_i32 = arith.constant 0 : i32
    %15 = vector.broadcast %c0_i32 : i32 to vector<10x128xi32>
    %16 = arith.cmpi eq, %14, %15 : vector<10x128xi32>
    %cst_3 = arith.constant 0.000000e+00 : f32
    %17 = vector.broadcast %cst_3 : f32 to vector<10x128xf32>
    %18 = arith.select %16, %11, %17 : vector<10x128xi1>, vector<10x128xf32>
    %cst_4 = arith.constant dense<0.000000e+00> : vector<128xf32>
    %19 = vector.multi_reduction <add>, %18, %cst_4 [0] : vector<10x128xf32> to vector<128xf32>
    %20 = vector.shape_cast %19 : vector<128xf32> to vector<1x128xf32>
    %cst_5 = arith.constant dense<0.000000e+00> : vector<128xf32>
    %21 = vector.multi_reduction <add>, %11, %cst_5 [0] : vector<10x128xf32> to vector<128xf32>
    %22 = vector.shape_cast %21 : vector<128xf32> to vector<1x128xf32>
    %23 = arith.subf %22, %20 : vector<1x128xf32>
    %24 = vector.broadcast %2 : f32 to vector<1x128xf32>
    %25 = arith.cmpf oge, %20, %24 : vector<1x128xf32>
    %26 = vector.broadcast %3 : f32 to vector<1x128xf32>
    %27 = arith.cmpf oge, %23, %26 : vector<1x128xf32>
    %28 = arith.andi %25, %27 : vector<1x128xi1>
    %29 = arith.extui %28 : vector<1x128xi1> to vector<1x128xi32>
    %c0_6 = arith.constant 0 : index
    %c0_7 = arith.constant 0 : index
    %30 = vector.load %arg4[%c0_6, %c0_7] : memref<1x128xi32, #tpu.memory_space<vmem>>, vector<1x128xi32>
    tpu.vector_store %arg4[%c0_6, %c0_7], %29 {strides = array<i32>} : memref<1x128xi32, #tpu.memory_space<vmem>>, vector<1x128xi32>,
    %31 = vector.broadcast %0 : f32 to vector<10x128xf32>
    %32 = arith.maximumf %31, %4 : vector<10x128xf32>
    %33 = vector.broadcast %1 : f32 to vector<10x128xf32>
    %34 = arith.minimumf %33, %32 : vector<10x128xf32>
    %c0_8 = arith.constant 0 : index
    %c0_9 = arith.constant 0 : index
    %35 = vector.load %arg3[%c0_8, %c0_9] : memref<10x128xf32, #tpu.memory_space<vmem>>, vector<10x128xf32>
    tpu.vector_store %arg3[%c0_8, %c0_9], %34 {strides = array<i32>} : memref<10x128xf32, #tpu.memory_space<vmem>>, vector<10x128xf32>,
    return
  }
  func.func @transform_0(%arg0: i32, %arg1: memref<4xf32, #tpu.memory_space<smem>>) -> (i32, i32) {
    %c0_i32 = arith.constant 0 : i32
    %c0_i32_0 = arith.constant 0 : i32
    return %c0_i32, %arg0 : i32, i32
  }
  func.func @transform_1(%arg0: i32, %arg1: memref<4xf32, #tpu.memory_space<smem>>) -> (i32, i32) {
    %c0_i32 = arith.constant 0 : i32
    %c0_i32_0 = arith.constant 0 : i32
    return %c0_i32, %arg0 : i32, i32
  }
  func.func @transform_2(%arg0: i32, %arg1: memref<4xf32, #tpu.memory_space<smem>>) -> (i32, i32) {
    %c0_i32 = arith.constant 0 : i32
    %c0_i32_0 = arith.constant 0 : i32
    return %c0_i32, %arg0 : i32, i32
  }
}

</mosaic_0001>

<bundles_post_ra>
// kernel: tpu_custom_call.1
= control target key start
LH: loop header
LB: loop body
LE: loop exit
PB: predicated region body
PF: predicated region fallthrough
CT: control target
= control target key end

     0   :  { %s235_s15 = smov [#allocation3]   ;;  %s295_s0 = inlined_call_operand.hbm [shape: f32[4], index: 0, kind: input, shape index: {}]   ;;  %s296_s1 = inlined_call_operand.hbm [shape: f32[10,128], index: 1, kind: input, shape index: {}]   ;;  %s297_s2 = inlined_call_operand.hbm [shape: f32[10,128], index: 2, kind: output, shape index: {0}]   ;;  %s298_s3 = inlined_call_operand.hbm [shape: s32[1,128], index: 3, kind: output, shape index: {1}]  }
   0x1   :  { %s10_s14 = sshll.u32 %s295_s0, 4  ;;  %s11_s14 = int_to_ptr.hbm [resolvable:$true] %s10_s14 }
   0x2   :  { %13 = dma.hbm_to_smem %s11_s14, 16, %s235_s15, [#allocation2] }
   0x3   :  { %227 = dma.done.wait [#allocation2], 16 }
   0x4   :  { %228 = vsyncadd [#allocation2], 4294967280 }
   0x5   :  { %16 = sfence }
   0x6   :  { %17 = vsyncpa [#allocation5], 0 }
   0x7   :  { %18 = vsyncpa [#allocation6], 0 }
   0x8   :  { %19 = vsyncpa [#allocation9], 0  ;;  %s24_s18 = sshll.u32 %s296_s1, 4  ;;  %s236_s19 = smov [#allocation4]   ;;  %s25_s18 = int_to_ptr.hbm [resolvable:$true] %s24_s18 }
   0x9   :  { %s26_s20 = sshll.u32 %s236_s19, 4  ;;  %s237_s21 = smov 128   ;;  %s27_s20 = int_to_ptr.vmem [resolvable:$true] %s26_s20 }
   0xa   :  { %s238_s22 = smov 8  }
   0xb   :  { %32 = dma.hbm_to_vmem [thread:$0]  %s25_s18, 256, %s27_s20, [#allocation5], %s237_s21, %s237_s21, %s238_s22  }
   0xc   :  { %229 = dma.done.wait [#allocation5], 256  }
   0xd   :  { %230 = vsyncadd [#allocation5], 4294967040  ;;  %v53_v0 = vlaneseq  ;;  %s37_s0 = sld [smem:[#allocation3]]  ;;  %v41_v5 = vld [vmem:[#allocation4] sm:$0xff]  ;;  %v42_v6 = vld [vmem:[#allocation4 + $0x8] sm:$0x3] }
   0xe   :  { %s130_s23 = sld [smem:[#allocation3 + $0x1]]  ;;  %vm43_vm1 = vcmp.ge.f32.partialorder %v41_v5, -0.1  ;;  %vm44_vm2 = vcmp.ge.f32.partialorder %v42_v6, -0.1  ;;  %vm62_vm7 = vcmask 1041408  }
   0xf   :  { %v54_v1 = vshrl.u32 %v53_v0, 7  ;;  %vm45_vm3 = vcmp.le.f32.partialorder %v41_v5, 1.1  ;;  %vm46_vm4 = vcmp.le.f32.partialorder %v42_v6, 1.1  ;;  %v239_v10 = vmov 0.0  }
  0x10   :  { %vm47_vm5 = vmand %vm43_vm1, %vm45_vm3  ;;  %s240_s1 = smov [#allocation7]   ;;  %s101_s27 = sshll.u32 %s297_s2, 4  ;;  %v242_v39 = vmov 0   ;;  %s102_s27 = int_to_ptr.hbm [resolvable:$true] %s101_s27 }
  0x11   :  { %v55_v2 = vadd.s32 8, %v54_v1  ;;  %v56_v3 = vand.u32 1, %v54_v1  ;;  %vm48_vm8 = vmand %vm44_vm2, %vm46_vm4  ;;  %v133_v11 = vsel %vm47_vm5, 1.0, %v239_v10  ;;  %s99_s24 = sshll.u32 %s240_s1, 4  ;;  %s131_s2 = sld [smem:[#allocation3 + $0x2]]  ;;  %s100_s24 = int_to_ptr.vmem [resolvable:$true] %s99_s24 }
  0x12   :  { %v134_v15 = vsel %vm48_vm8, 1.0, %v239_v10  ;;  %s132_s28 = sld [smem:[#allocation3 + $0x3]]  ;;  %s241_s29 = smov [#allocation8]  }
  0x13   :  { %v57_v4 = vand.u32 1, %v55_v2  ;;  %vm272_vm0 = vcmp.eq.s32.totalorder %v56_v3, 0  ;;  %v87_v9 = vstv %s37_s0  ;;  %v71_v18 = vsel %vm62_vm7, %v134_v15, 0.0  ;;  %s113_s30 = sshll.u32 %s241_s29, 4  ;;  %s115_s6 = sshll.u32 %s298_s3, 4  ;;  %s114_s30 = int_to_ptr.vmem [resolvable:$true] %s113_s30  ;;  %s116_s6 = int_to_ptr.hbm [resolvable:$true] %s115_s6 }
  0x14   :  { %v88_v12 = vmax.f32 %v87_v9, %v41_v5  ;;  %v90_v13 = vstv %s130_s23  ;;  %v89_v14 = vmax.f32 %v87_v9, %v42_v6  ;;  %v60_v16 = vsel %vm272_vm0, %v133_v11, 0.0 }
  0x15   :  { %vm276_vm6 = vcmp.eq.s32.totalorder %v57_v4, 0  ;;  %v72_v22 = vadd.f32 %v133_v11, %v71_v18 }
  0x16   :  { %v61_v17 = vsel %vm276_vm6, %v134_v15, 0.0  ;;  %v91_v19 = vmin.f32 %v90_v13, %v88_v12  ;;  %v92_v20 = vmin.f32 %v90_v13, %v89_v14 }
  0x17   :  { %v63_v21 = vsel %vm62_vm7, %v61_v17, 0.0  ;;  %v73_v24 = vrot.slane %v72_v22, 4  ;;  %v80_v35 = vstv %s131_s2 }
  0x18   :  { %v64_v23 = vadd.f32 %v63_v21, %v60_v16  ;;  %93 = vst [vmem:[#allocation7] sm:$0xff] %v91_v19  ;;  %v82_v37 = vstv %s132_s28 }
  0x19   :  { %94 = vst [vmem:[#allocation7 + $0x8] sm:$0x3] %v92_v20  ;;  %v74_v26 = vadd.f32 %v73_v24, %v72_v22 }
  0x1a   :  { %v65_v25 = vrot.slane %v64_v23, 4  ;;  %107 = dma.vmem_to_hbm [thread:$0]  %s100_s24, 256, %s102_s27, [#allocation6], %s237_s21, %s237_s21, %s238_s22  }
  0x1b   :  { %v75_v28 = vrot.slane %v74_v26, 2 }
  0x1c   :  { %v66_v27 = vadd.f32 %v65_v25, %v64_v23 }
  0x1d   :  { %v76_v30 = vadd.f32 %v75_v28, %v74_v26 }
  0x1e   :  { %v67_v29 = vrot.slane %v66_v27, 2 }
  0x1f   :  { %v77_v32 = vrot.slane %v76_v30, 1 }
  0x20   :  { %v68_v31 = vadd.f32 %v67_v29, %v66_v27 }
  0x21   :  { %v78_v34 = vadd.f32 %v77_v32, %v76_v30 }
  0x22   :  { %v69_v33 = vrot.slane %v68_v31, 1 }
  0x24   :  { %v70_v36 = vadd.f32 %v69_v33, %v68_v31 }
  0x26   :  { %v79_v38 = vsub.f32 %v78_v34, %v70_v36  ;;  %vm81_vm9 = vcmp.ge.f32.partialorder %v70_v36, %v80_v35 }
  0x28   :  { %vm83_vm10 = vcmp.ge.f32.partialorder %v79_v38, %v82_v37 }
  0x29   :  { %vm84_vm11 = vmand %vm81_vm9, %vm83_vm10 }
  0x2a   :  { %v85_v40 = vsel %vm84_vm11, 1, %v242_v39 }
  0x2b   :  { %86 = vst [vmem:[#allocation8] sm:$0x1] %v85_v40 }
  0x2c   :  { %118 = dma.vmem_to_hbm [thread:$0]  %s114_s30, 16, %s116_s6, [#allocation9]  }
  0x2d   :  { %231 = dma.done.wait [#allocation6], 256  }
  0x2e   :  { %232 = vsyncadd [#allocation6], 4294967040 }
  0x2f   :  { %233 = dma.done.wait [#allocation9], 16  }
  0x30   :  { %234 = vsyncadd [#allocation9], 4294967280 }
  0x31   :  { %127 = vsyncpa [#allocation5], 1 }
  0x32   :  { %128 = vsyncpa [#allocation6], 1 }
  0x33   :  { %129 = vsyncpa [#allocation9], 1 }

</bundles_post_ra>
